<compile_context>
chip_gen: v7x
topology: tpu7x:2x2x1
jax: 0.10.0
libtpu: 0.0.40
codegen_flags: <defaults>
</compile_context>

<pallas_src>
import functools

import jax
import jax.numpy as jnp
from jax.experimental import pallas as pl
from jax.experimental.pallas import tpu as pltpu


def _round_up(x: int, m: int) -> int:
    return ((x + m - 1) // m) * m


def _apply_activation(z, activation: str):
    if activation == "step":
        return (z >= 0.0).astype(z.dtype)
    if activation == "sign":
        return jnp.sign(z)
    if activation == "linear":
        return z
    raise ValueError(f"Unknown activation function: {activation}")


def perceptron_kernel(x_ref, w_ref, b_ref, o_ref, *, activation: str):
    """One (tm, tn) output tile; K (reduction) is the innermost grid axis.

    The f32 output block is resident across the K axis, so it doubles as the
    accumulator (no VMEM scratch): init with bias at k==0, accumulate for
    k>0, apply the activation exactly once at k==last.
    """
    k = pl.program_id(2)
    nk = pl.num_programs(2)

    partial = jnp.dot(x_ref[...], w_ref[...], preferred_element_type=jnp.float32)

    @pl.when(k == 0)
    def _():
        o_ref[...] = partial + b_ref[...]          # (tm,tn) + (1,tn) broadcast

    @pl.when(k > 0)
    def _():
        o_ref[...] = o_ref[...] + partial

    @pl.when(k == nk - 1)
    def _():
        o_ref[...] = _apply_activation(o_ref[...], activation)


def _choose_tiles(B: int, D: int, O: int):
    """Pick (tm, tn, tk) adaptively for the problem shape."""
    # Single-block path: tiny/medium layers fit one VMEM block per operand.
    # Block shape == array shape, so no (8,128) alignment padding is required
    # and there is no per-grid-step pipeline overhead at all.
    if B <= 512 and D <= 2048 and O <= 512:
        return B, O, D

    # Tiled path: large, 256-aligned N/K tiles for the v6e/v7x 2x256 MXU and
    # near-roofline DMA efficiency; M only 8-aligned (f32/bf16 sublane rule)
    # so a small batch never gets padded to 128.
    tm = min(_round_up(B, 8), 512)
    tn = min(_round_up(O, 128), 512)
    tk = min(_round_up(D, 128), 1024)

    # v7x has 2 TensorCores: if both parallel grid axes collapsed to a single
    # block, split N (keeping 128-alignment) so the second core gets work.
    grid_m = _round_up(B, tm) // tm
    grid_n = _round_up(O, tn) // tn
    if grid_m == 1 and grid_n == 1 and tn >= 256 and tn % 256 == 0:
        tn //= 2
    return tm, tn, tk


def perceptron_forward(x, weights, bias=None, *, activation: str = "step",
                       compute_dtype=jnp.bfloat16):
    """x: (B, D), weights: (D, O), bias: (O,) or None -> (B, O) f32."""
    B, D = x.shape
    D2, O = weights.shape
    assert D == D2, "weights shape must be (input_size, output_size)"
    if bias is None:
        bias = jnp.zeros((O,), dtype=jnp.float32)

    tm, tn, tk = _choose_tiles(B, D, O)
    Mp, Kp, Np = _round_up(B, tm), _round_up(D, tk), _round_up(O, tn)

    xp = x.astype(compute_dtype)
    wp = weights.astype(compute_dtype)
    bp = bias.astype(jnp.float32).reshape(1, O)

    # Pad only when needed.  Zero padding is exact for the contraction; padded
    # output columns (step(0)=1) are sliced off below.  TODO(synk): for
    # repeated calls at fixed shapes, pre-pad/pre-cast W once outside this
    # function so it is not re-copied in HBM every forward.
    if (Mp, Kp) != (B, D):
        xp = jnp.pad(xp, ((0, Mp - B), (0, Kp - D)))
    if (Kp, Np) != (D, O):
        wp = jnp.pad(wp, ((0, Kp - D), (0, Np - O)))
    if Np != O:
        bp = jnp.pad(bp, ((0, 0), (0, Np - O)))

    grid = (Mp // tm, Np // tn, Kp // tk)

    out = pl.pallas_call(
        functools.partial(perceptron_kernel, activation=activation),
        out_shape=jax.ShapeDtypeStruct((Mp, Np), jnp.float32),
        grid_spec=pltpu.PrefetchScalarGridSpec(
            num_scalar_prefetch=0,
            grid=grid,
            in_specs=[
                pl.BlockSpec((tm, tk), lambda i, j, k: (i, k)),   # x tile
                pl.BlockSpec((tk, tn), lambda i, j, k: (k, j)),   # W tile
                pl.BlockSpec((1, tn), lambda i, j, k: (0, j)),    # bias (N only)
            ],
            out_specs=pl.BlockSpec((tm, tn), lambda i, j, k: (i, j)),
        ),
        compiler_params=pltpu.CompilerParams(
            dimension_semantics=("parallel", "parallel", "arbitrary"),
        ),
    )(xp, wp, bp)

    if (Mp, Np) != (B, O):
        out = out[:B, :O]
    return out


if __name__ == "__main__":
    # Small shapes consistent with the module's forward:
    # x: (batch, input_size), weights: (input_size, output_size), bias: (output_size,)
    batch, input_size, output_size = 8, 32, 8

    key = jax.random.PRNGKey(0)
    kx, kw = jax.random.split(key)

    x = jax.random.normal(kx, (batch, input_size), dtype=jnp.float32)
    # Deterministic init mirroring nn.init.normal_(weights, mean=0.0, std=0.1)
    weights = 0.1 * jax.random.normal(kw, (input_size, output_size), dtype=jnp.float32)
    # nn.init.zeros_(bias)
    bias = jnp.zeros((output_size,), dtype=jnp.float32)

    out = perceptron_forward(x, weights, bias)
    out = jax.block_until_ready(out)

    # Reference using the same bf16 operand cast / f32 accumulation the kernel
    # uses.  (No claim of bit-exactness vs a true-f32 PyTorch matmul: the TPU
    # MXU computes in bf16 passes at default precision anyway.)
    cd = jnp.bfloat16
    logits = jnp.dot(x.astype(cd), weights.astype(cd),
                     preferred_element_type=jnp.float32) + bias
    ref = (logits >= 0.0).astype(jnp.float32)

    assert out.shape == (batch, output_size)
    assert jnp.array_equal(out, ref), "Pallas output mismatch vs reference"

    print("KERNEL_OK")
</pallas_src>

<mosaic_0001>
module attributes {stable_mosaic.version = 11 : i64} {
  func.func @perceptron_kernel(%arg0: i32, %arg1: i32, %arg2: i32, %arg3: memref<8x32xbf16, #tpu.memory_space<vmem>>, %arg4: memref<32x8xbf16, #tpu.memory_space<vmem>>, %arg5: memref<1x8xf32, #tpu.memory_space<vmem>>, %arg6: memref<8x8xf32, #tpu.memory_space<vmem>>) attributes {dimension_semantics = [#tpu.dimension_semantics<parallel>, #tpu.dimension_semantics<parallel>, #tpu.dimension_semantics<arbitrary>], iteration_bounds = array<i64: 1, 1, 1>, scalar_prefetch = 0 : i64, scratch_operands = 0 : i64, tpu.core_type = #tpu.core_type<tc>, window_params = [{transform_indices = @transform_0, window_bounds = array<i64: 8, 32>}, {transform_indices = @transform_1, window_bounds = array<i64: 32, 8>}, {transform_indices = @transform_2, window_bounds = array<i64: 1, 8>}, {transform_indices = @transform_3, window_bounds = array<i64: 8, 8>}]} {
    %c0 = arith.constant 0 : index
    %c0_0 = arith.constant 0 : index
    %0 = vector.load %arg3[%c0, %c0_0] : memref<8x32xbf16, #tpu.memory_space<vmem>>, vector<8x32xbf16>
    %c0_1 = arith.constant 0 : index
    %c0_2 = arith.constant 0 : index
    %1 = vector.load %arg4[%c0_1, %c0_2] : memref<32x8xbf16, #tpu.memory_space<vmem>>, vector<32x8xbf16>
    %cst = arith.constant dense<0.000000e+00> : vector<8x8xf32>
    %2 = tpu.matmul %0, %1, %cst {dimension_numbers = #tpu.dot_dimension_numbers<[1], [0], [0], [1], [0, 0, 1, 1], [], []>} : vector<8x32xbf16>, vector<32x8xbf16>, vector<8x8xf32> -> vector<8x8xf32>
    %c0_i32 = arith.constant 0 : i32
    %3 = arith.cmpi eq, %arg2, %c0_i32 : i32
    %4 = arith.extui %3 : i1 to i32
    %c0_i32_3 = arith.constant 0 : i32
    %5 = arith.cmpi ne, %4, %c0_i32_3 : i32
    scf.if %5 {
      %c0_8 = arith.constant 0 : index
      %c0_9 = arith.constant 0 : index
      %12 = vector.load %arg5[%c0_8, %c0_9] : memref<1x8xf32, #tpu.memory_space<vmem>>, vector<1x8xf32>
      %13 = vector.broadcast %12 : vector<1x8xf32> to vector<8x8xf32>
      %14 = arith.addf %2, %13 : vector<8x8xf32>
      %c0_10 = arith.constant 0 : index
      %c0_11 = arith.constant 0 : index
      %15 = vector.load %arg6[%c0_10, %c0_11] : memref<8x8xf32, #tpu.memory_space<vmem>>, vector<8x8xf32>
      tpu.vector_store %arg6[%c0_10, %c0_11], %14 {strides = array<i32>} : memref<8x8xf32, #tpu.memory_space<vmem>>, vector<8x8xf32>,
    } else {
    }
    %c0_i32_4 = arith.constant 0 : i32
    %6 = arith.cmpi sgt, %arg2, %c0_i32_4 : i32
    %7 = arith.extui %6 : i1 to i32
    %c0_i32_5 = arith.constant 0 : i32
    %8 = arith.cmpi ne, %7, %c0_i32_5 : i32
    scf.if %8 {
      %c0_8 = arith.constant 0 : index
      %c0_9 = arith.constant 0 : index
      %12 = vector.load %arg6[%c0_8, %c0_9] : memref<8x8xf32, #tpu.memory_space<vmem>>, vector<8x8xf32>
      %13 = arith.addf %12, %2 : vector<8x8xf32>
      %c0_10 = arith.constant 0 : index
      %c0_11 = arith.constant 0 : index
      %14 = vector.load %arg6[%c0_10, %c0_11] : memref<8x8xf32, #tpu.memory_space<vmem>>, vector<8x8xf32>
      tpu.vector_store %arg6[%c0_10, %c0_11], %13 {strides = array<i32>} : memref<8x8xf32, #tpu.memory_space<vmem>>, vector<8x8xf32>,
    } else {
    }
    %c0_i32_6 = arith.constant 0 : i32
    %9 = arith.cmpi eq, %arg2, %c0_i32_6 : i32
    %10 = arith.extui %9 : i1 to i32
    %c0_i32_7 = arith.constant 0 : i32
    %11 = arith.cmpi ne, %10, %c0_i32_7 : i32
    scf.if %11 {
      %c0_8 = arith.constant 0 : index
      %c0_9 = arith.constant 0 : index
      %12 = vector.load %arg6[%c0_8, %c0_9] : memref<8x8xf32, #tpu.memory_space<vmem>>, vector<8x8xf32>
      %cst_10 = arith.constant 0.000000e+00 : f32
      %13 = vector.broadcast %cst_10 : f32 to vector<8x8xf32>
      %14 = arith.cmpf oge, %12, %13 : vector<8x8xf32>
      %15 = arith.extui %14 : vector<8x8xi1> to vector<8x8xi32>
      %16 = arith.sitofp %15 : vector<8x8xi32> to vector<8x8xf32>
      %c0_11 = arith.constant 0 : index
      %c0_12 = arith.constant 0 : index
      %17 = vector.load %arg6[%c0_11, %c0_12] : memref<8x8xf32, #tpu.memory_space<vmem>>, vector<8x8xf32>
      tpu.vector_store %arg6[%c0_11, %c0_12], %16 {strides = array<i32>} : memref<8x8xf32, #tpu.memory_space<vmem>>, vector<8x8xf32>,
    } else {
    }
    return
  }
  func.func @transform_0(%arg0: i32, %arg1: i32, %arg2: i32) -> (i32, i32) {
    %c0_i32 = arith.constant 0 : i32
    return %arg0, %arg2 : i32, i32
  }
  func.func @transform_1(%arg0: i32, %arg1: i32, %arg2: i32) -> (i32, i32) {
    %c0_i32 = arith.constant 0 : i32
    return %arg2, %arg1 : i32, i32
  }
  func.func @transform_2(%arg0: i32, %arg1: i32, %arg2: i32) -> (i32, i32) {
    %c0_i32 = arith.constant 0 : i32
    %c0_i32_0 = arith.constant 0 : i32
    return %c0_i32, %arg1 : i32, i32
  }
  func.func @transform_3(%arg0: i32, %arg1: i32, %arg2: i32) -> (i32, i32) {
    %c0_i32 = arith.constant 0 : i32
    return %arg0, %arg1 : i32, i32
  }
}

</mosaic_0001>

<bundles_post_ra>
// kernel: tpu_custom_call.1
= control target key start
LH: loop header
LB: loop body
LE: loop exit
PB: predicated region body
PF: predicated region fallthrough
CT: control target
= control target key end

     0   :  { %v167_v1 = vmov 0.0   ;;  %vm168_vm0 = vmmov 0   ;;  %s214_s0 = inlined_call_operand.vmem [shape: bf16[8,32], index: 0, kind: input, shape index: {}]   ;;  %s215_s1 = inlined_call_operand.vmem [shape: bf16[32,8], index: 1, kind: input, shape index: {}]   ;;  %s216_s2 = inlined_call_operand.vmem [shape: f32[1,8], index: 2, kind: input, shape index: {}]   ;;  %s217_s3 = inlined_call_operand.hbm [shape: f32[8,8], index: 3, kind: output, shape index: {}]  }
   0x1   :  { %v141_v0 = vld [vmem:[%s215_s1] sm:$0xff]   ;;  %130 = vmatprep.subr.bf16.mxu0 %v167_v1  ;;  %v142_v2 = vld [vmem:[%s215_s1 + $0x8] sm:$0xff]   ;;  %134 = vmatprep.mubr.msk.bf16.mxu0 %vm168_vm0, %v167_v1 }
   0x2   :  { %131 = vmatpush3.bf16.msra.mxu0 %v141_v0 }
   0x3   :  { %8 = vsyncpa [#allocation3], 0  ;;  %132 = vmatprep.subr.bf16.mxu0 %v167_v1  ;;  %v16_v3 = vld [vmem:[%s214_s0] sm:$0xf]  ;;  %vm33_vm1 = vcmask 261120   ;;  %vm89_vm2 = vcmask 64512  }
   0x4   :  { %v125_v4 = vld [vmem:[%s216_s2] ss:$0 sm:$0xff]  ;;  %s169_s1 = smov [#allocation2]  }
   0x5   :  { %s114_s20 = sshll.u32 %s169_s1, 4  ;;  %s115_s20 = int_to_ptr.vmem [resolvable:$true] %s114_s20 }
   0x6   :  { %133 = vmatpush3.bf16.msra.mxu0 %v142_v2  ;;  %s143_s0 = scalar_lea.vmem %s115_s20, 128  ;;  %p148_p1 = scmp.lt.s32.totalorder %s115_s20, %s115_s20 }
   0x7   :  { %p144_p0 = scmp.ne.s32.totalorder %s115_s20, %s143_s0  ;;  %p149_p2 = scmp.lt.s32.totalorder %s143_s0, %s143_s0 }
   0x9   :  { %135 = vmatmul.mubr.msk.bf16.vlgmr.msra.gmra.mrb[0].mxu0 %vm33_vm1, %v16_v3  ;;  %p150_p3 = por %p149_p2, %p148_p1 }
   0xb   :  { %p151_p4 = pnand %p150_p3, %p144_p0 }
  0xdc   :  { %v71_v5 = vpop.f32.mrb[0].mxu0 }
  0xdd   :  { %v88_v6 = vadd.f32 %v125_v4, %v71_v5  ;;  %v136_v7 = vpop.f32.mrb[1].mxu0 }
  0xde   :  { %v74_v8 = vpop.f32.mrb[2].mxu0 }
  0xdf   :  { %90 = vst.msk [vmem:[#allocation2] sm:$0xff] %vm89_vm2, %v88_v6  ;;  %v137_v9 = vpop.f32.mrb[3].mxu0 }
  0xe6   :  { %v102_v10 = vld [vmem:[#allocation2] sm:$0xff] }
  0xe7   :  { %vm103_vm3 = vcmp.ge.f32.partialorder %v102_v10, 0.0 }
  0xe8   :  { %v126_v11 = vsel %vm103_vm3, 1.0, %v167_v1 }
  0xe9   :  { %107 = vst.msk [vmem:[#allocation2] sm:$0xff] %vm89_vm2, %v126_v11 }
  0xea   :  { %154 = shalt.err (!%p151_p4)
}
  0xeb   :  { %s155_s22 = scalar_lea.hbm %s217_s3, 128 }
  0xec   :  { %p156_p5 = scmp.ne.s32.totalorder %s217_s3, %s155_s22  ;;  %p159_p6 = scmp.lt.u32.totalorder %s155_s22, %s217_s3 }
  0xee   :  { %p161_p7 = pnand %p159_p6, %p156_p5 }
  0xf0   :  { %164 = shalt.err (!%p161_p7)
}
  0xf1   :  { %117 = dma.vmem_to_hbm [thread:$0]  %s115_s20, 128, %s217_s3, [#allocation3]  }
  0xf2   :  { %165 = dma.done.wait [#allocation3], 128  }
  0xf3   :  { %166 = vsyncadd [#allocation3], 4294967168 }
  0xf4   :  { %121 = vsyncpa [#allocation3], 1 }

</bundles_post_ra>
